<compile_context>
chip_gen: v6e
topology: v6e:2x2x1
jax: 0.10.0
libtpu: 0.0.40
codegen_flags: <defaults>
</compile_context>

<pallas_src>
import jax
import jax.numpy as jnp
from jax.experimental import pallas as pl
from jax.experimental.pallas import tpu as pltpu


def _identity_kernel(x_ref, o_ref):
    # Pure copy: the hot path of Identity is just moving the tile through VMEM.
    o_ref[...] = x_ref[...]


def identity(x, *, donate_input=False):
    """Pallas-backed Identity: returns a tensor equal to x (same shape/dtype).

    If `donate_input=True` (caller donates x at the jit boundary), the output
    aliases the input HBM buffer so no fresh result buffer is materialized.
    """
    if x.size == 0:
        return x

    orig_shape = x.shape
    dtype = x.dtype
    n = x.size
    itemsize = jnp.dtype(dtype).itemsize
    # Minimum row (sublane) granularity so packed dtypes keep full tiles:
    # 8 rows for 4-byte, 16 for 2-byte, 32 for 1-byte elements.
    sublanes = max(8, 32 // itemsize)

    alias = {0: 0} if donate_input else {}

    # Pick the widest lane-dense column count that divides n exactly, so the
    # flat 2-D view is a free (metadata-only) reshape -- no padded copy and
    # no post-slice copy.
    cols = 0
    for c in (2048, 1024, 512, 256, 128):
        if n % c == 0:
            cols = c
            break

    if cols == 0:
        # Element count not a multiple of 128 (rare): copy the whole array as
        # a single block.  Still exactly one pass through HBM.
        # TODO(synk): tile this fallback if it ever has to handle arrays that
        # do not fit in VMEM.
        out = pl.pallas_call(
            _identity_kernel,
            out_shape=jax.ShapeDtypeStruct((1, n), dtype),
            input_output_aliases=alias,
        )(x.reshape(1, n))
        return out.reshape(orig_shape)

    rows = n // cols

    # ~2 MiB blocks: big enough to hide the ~0.35 us/step grid overhead and
    # reach ~85% of the HBM roofline (measured on v6e), small enough that the
    # double-buffered input + output (~8 MiB total) fits every generation's
    # scoped-VMEM default (16 MiB on v5e, 32 MiB on v6e/v7x) -- no
    # vmem_limit_bytes override needed.
    target_block_bytes = 2 * 1024 * 1024
    tile_rows = max(sublanes, target_block_bytes // (cols * itemsize))
    tile_rows = (tile_rows // sublanes) * sublanes
    if rows <= tile_rows:
        # Single block along rows; a full-extent block dim is always legal
        # even when it is not a multiple of the sublane granularity.
        tile_rows = rows

    grid = (pl.cdiv(rows, tile_rows),)  # edge block (if any) is masked by Pallas

    out2d = pl.pallas_call(
        _identity_kernel,
        out_shape=jax.ShapeDtypeStruct((rows, cols), dtype),
        grid=grid,
        in_specs=[pl.BlockSpec((tile_rows, cols), lambda i: (i, 0))],
        out_specs=pl.BlockSpec((tile_rows, cols), lambda i: (i, 0)),
        input_output_aliases=alias,
        compiler_params=pltpu.CompilerParams(
            dimension_semantics=("parallel",)),  # megacore sharding on v7x
    )(x.reshape(rows, cols))

    return out2d.reshape(orig_shape)


if __name__ == "__main__":
    key = jax.random.PRNGKey(0)

    # Shape consistent with the module's typical NCHW input.
    x = jax.random.normal(key, (2, 4, 16, 16), dtype=jnp.float32)
    y = identity(x)
    jax.block_until_ready(y)
    assert y.shape == x.shape and y.dtype == x.dtype
    assert bool(jnp.all(y == x))

    # Packed-dtype path (bf16 -> 16-row sublane granularity).
    xb = jax.random.normal(key, (2, 4, 16, 16), dtype=jnp.float32).astype(jnp.bfloat16)
    yb = identity(xb)
    jax.block_until_ready(yb)
    assert yb.shape == xb.shape and yb.dtype == xb.dtype
    assert bool(jnp.all(yb == xb))

    print("KERNEL_OK")
</pallas_src>

<mosaic_0001>
module attributes {stable_mosaic.version = 11 : i64} {
  func.func @_identity_kernel(%arg0: i32, %arg1: memref<1x2048xf32, #tpu.memory_space<vmem>>, %arg2: memref<1x2048xf32, #tpu.memory_space<vmem>>) attributes {dimension_semantics = [#tpu.dimension_semantics<parallel>], iteration_bounds = array<i64: 1>, scalar_prefetch = 0 : i64, scratch_operands = 0 : i64, tpu.core_type = #tpu.core_type<tc>, window_params = [{transform_indices = @transform_0, window_bounds = array<i64: 1, 2048>}, {transform_indices = @transform_1, window_bounds = array<i64: 1, 2048>}]} {
    %c0 = arith.constant 0 : index
    %c0_0 = arith.constant 0 : index
    %0 = vector.load %arg1[%c0, %c0_0] : memref<1x2048xf32, #tpu.memory_space<vmem>>, vector<1x2048xf32>
    %c0_1 = arith.constant 0 : index
    %c0_2 = arith.constant 0 : index
    %1 = vector.load %arg2[%c0_1, %c0_2] : memref<1x2048xf32, #tpu.memory_space<vmem>>, vector<1x2048xf32>
    tpu.vector_store %arg2[%c0_1, %c0_2], %0 {strides = array<i32>} : memref<1x2048xf32, #tpu.memory_space<vmem>>, vector<1x2048xf32>,
    return
  }
  func.func @transform_0(%arg0: i32) -> (i32, i32) {
    %c0_i32 = arith.constant 0 : i32
    %c0_i32_0 = arith.constant 0 : i32
    return %arg0, %c0_i32 : i32, i32
  }
  func.func @transform_1(%arg0: i32) -> (i32, i32) {
    %c0_i32 = arith.constant 0 : i32
    %c0_i32_0 = arith.constant 0 : i32
    return %arg0, %c0_i32 : i32, i32
  }
}

</mosaic_0001>

<bundles_post_ra>
// kernel: tpu_custom_call.1
= control target key start
LH: loop header
LB: loop body
LE: loop exit
PB: predicated region body
PF: predicated region fallthrough
CT: control target
= control target key end

     0   :  { %6 = vsyncpa [#allocation3], 0  ;;  %s104_s0 = inlined_call_operand.hbm [shape: f32[1,2048], index: 0, kind: input, shape index: {}]   ;;  %s105_s1 = inlined_call_operand.hbm [shape: f32[1,2048], index: 1, kind: output, shape index: {}]  }
   0x1   :  { %7 = vsyncpa [#allocation4], 0  ;;  %s86_s6 = smov [#allocation2]  }
   0x2   :  { %s14_s7 = sshll.u32 %s86_s6, 4  ;;  %s15_s7 = int_to_ptr.vmem [resolvable:$true] %s14_s7 }
   0x3   :  { %s50_s8 = scalar_lea.vmem %s15_s7, 256  ;;  %p55_p1 = scmp.lt.s32.totalorder %s15_s7, %s15_s7 }
   0x4   :  { %p51_p0 = scmp.ne.s32.totalorder %s15_s7, %s50_s8  ;;  %p56_p2 = scmp.lt.s32.totalorder %s50_s8, %s50_s8 }
   0x6   :  { %p57_p3 = por %p56_p2, %p55_p1 }
   0x8   :  { %p58_p4 = pnand %p57_p3, %p51_p0 }
   0xa   :  { %61 = shalt.err (!%p58_p4)
}
   0xb   :  { %17 = dma.hbm_to_vmem [thread:$0]  %s104_s0, 256, %s15_s7, [#allocation3]  }
   0xc   :  { %82 = dma.done.wait [#allocation3], 256  }
   0xd   :  { %83 = vsyncadd [#allocation3], 4294967040  ;;  %s87_s11 = smov [#allocation5]   ;;  %v21_v0 = vld [vmem:[#allocation2] sm:$0xff]  ;;  %v22_v1 = vld [vmem:[#allocation2 + $0x8] sm:$0xff] }
   0xe   :  { %s31_s12 = sshll.u32 %s87_s11, 4  ;;  %23 = vst [vmem:[#allocation5] sm:$0xff] %v21_v0  ;;  %24 = vst [vmem:[#allocation5 + $0x8] sm:$0xff] %v22_v1  ;;  %s32_s12 = int_to_ptr.vmem [resolvable:$true] %s31_s12 }
   0xf   :  { %s62_s13 = scalar_lea.vmem %s32_s12, 256  ;;  %p67_p6 = scmp.lt.s32.totalorder %s32_s12, %s32_s12 }
  0x10   :  { %p63_p5 = scmp.ne.s32.totalorder %s32_s12, %s62_s13  ;;  %p68_p7 = scmp.lt.s32.totalorder %s62_s13, %s62_s13 }
  0x12   :  { %p69_p8 = por %p68_p7, %p67_p6 }
  0x14   :  { %p70_p9 = pnand %p69_p8, %p63_p5 }
  0x16   :  { %73 = shalt.err (!%p70_p9)
}
  0x17   :  { %34 = dma.vmem_to_hbm [thread:$0]  %s32_s12, 256, %s105_s1, [#allocation4]  }
  0x18   :  { %84 = dma.done.wait [#allocation4], 256  }
  0x19   :  { %85 = vsyncadd [#allocation4], 4294967040 }
  0x1a   :  { %38 = vsyncpa [#allocation3], 1 }
  0x1b   :  { %39 = vsyncpa [#allocation4], 1 }

</bundles_post_ra>
